<compile_context>
chip_gen: v7x
topology: tpu7x:2x2x1
jax: 0.10.0
libtpu: 0.0.40
codegen_flags: <defaults>
</compile_context>

<pallas_src>
import jax
import jax.numpy as jnp
from jax.experimental import pallas as pl
from jax.experimental.pallas import tpu as pltpu


def _round_up(x: int, m: int) -> int:
    return (x + m - 1) // m * m


def critic_kernel(x_ref, w1_ref, b1_ref, w2_ref, b2_ref, o_ref):
    # x_ref:  [TM, S]   streamed batch tile
    # w1_ref: [S, Hp]   VMEM-resident first-layer weight (pre-transposed)
    # b1_ref: [1, Hp]
    # w2_ref: [1, Hp]   second-layer weight as a row
    # b2_ref: [1, 1]    SMEM scalar
    # o_ref:  [1, TM]   lane-dense output slab
    x = x_ref[...]
    h = jnp.dot(x, w1_ref[...], preferred_element_type=jnp.float32)   # MXU
    h = jnp.maximum(h + b1_ref[...], 0.0)                             # bias + ReLU (VPU)
    # Layer 2: avoid a 1-wide MXU matmul; VPU multiply + cross-lane reduce,
    # then add the SMEM scalar bias.
    v = jnp.sum(h * w2_ref[...], axis=-1) + b2_ref[0, 0]              # [TM]
    o_ref[...] = v.reshape(1, -1).astype(o_ref.dtype)                 # lane-dense store


def critic_forward(state, w1, b1, w2, b2, *, block_b: int = 1024):
    """state: [B, S]; w1: [S, H]; b1: [1, H]; w2: [H, 1]; b2: [1, 1] -> [B, 1]."""
    B, S = state.shape
    H = w1.shape[1]

    # Pad hidden dim to a full lane group (zeros -> result unchanged).
    Hp = _round_up(H, 128)
    if Hp != H:
        w1 = jnp.pad(w1, ((0, 0), (0, Hp - H)))
        b1 = jnp.pad(b1, ((0, 0), (0, Hp - H)))
        w2 = jnp.pad(w2, ((0, Hp - H), (0, 0)))
    w2_row = w2.reshape(1, Hp)
    b2 = jnp.asarray(b2, jnp.float32).reshape(1, 1)

    # Batch tile: single full tile for small B, (8,128)-aligned tiles otherwise.
    if B <= block_b:
        TM, G = B, 1
    else:
        TM = max(128, (block_b // 128) * 128)
        G = pl.cdiv(B, TM)
    B_pad = G * TM
    if B_pad != B:
        state = jnp.pad(state, ((0, B_pad - B), (0, 0)))

    out = pl.pallas_call(
        critic_kernel,
        out_shape=jax.ShapeDtypeStruct((1, B_pad), jnp.float32),
        grid=(G,),
        in_specs=[
            pl.BlockSpec((TM, S), lambda i: (i, 0)),             # streamed state tile
            pl.BlockSpec((S, Hp), lambda i: (0, 0)),             # resident weights
            pl.BlockSpec((1, Hp), lambda i: (0, 0)),
            pl.BlockSpec((1, Hp), lambda i: (0, 0)),
            pl.BlockSpec(memory_space=pltpu.MemorySpace.SMEM),   # b2 scalar
        ],
        out_specs=pl.BlockSpec((1, TM), lambda i: (0, i)),       # lane-dense output
        compiler_params=pltpu.CompilerParams(
            dimension_semantics=("parallel",),                   # v7x: both TCs
        ),
    )(state, w1, b1, w2_row, b2)

    return out[0, :B].reshape(B, 1)


def init_critic_params(key, state_dim, hidden_dim):
    """Deterministic init mirroring nn.Linear's uniform(-1/sqrt(fan_in), 1/sqrt(fan_in))."""
    k1, k2, k3, k4 = jax.random.split(key, 4)
    lim1 = 1.0 / jnp.sqrt(state_dim)
    lim2 = 1.0 / jnp.sqrt(hidden_dim)
    w1 = jax.random.uniform(k1, (state_dim, hidden_dim), jnp.float32, -lim1, lim1)
    b1 = jax.random.uniform(k2, (1, hidden_dim), jnp.float32, -lim1, lim1)
    w2 = jax.random.uniform(k3, (hidden_dim, 1), jnp.float32, -lim2, lim2)
    b2 = jax.random.uniform(k4, (1, 1), jnp.float32, -lim2, lim2)
    return w1, b1, w2, b2


if __name__ == "__main__":
    key = jax.random.PRNGKey(0)
    k_params, k_state, k_big = jax.random.split(key, 3)

    batch = 8
    state_dim = 4      # CartPole observation size
    hidden_dim = 32

    w1, b1, w2, b2 = init_critic_params(k_params, state_dim, hidden_dim)

    # --- small-shape check (single tile, grid=(1,)) ---
    state = jax.random.normal(k_state, (batch, state_dim), jnp.float32)
    out = jax.block_until_ready(critic_forward(state, w1, b1, w2, b2))
    ref = jnp.maximum(state @ w1 + b1, 0.0) @ w2 + b2
    assert out.shape == (batch, 1)
    assert jnp.allclose(out, ref, atol=1e-5), "mismatch vs reference (small batch)"

    # --- multi-tile check (exercises the batch grid + edge-padding path) ---
    big_batch = 1000
    state_big = jax.random.normal(k_big, (big_batch, state_dim), jnp.float32)
    out_big = jax.block_until_ready(
        critic_forward(state_big, w1, b1, w2, b2, block_b=256))
    ref_big = jnp.maximum(state_big @ w1 + b1, 0.0) @ w2 + b2
    assert out_big.shape == (big_batch, 1)
    assert jnp.allclose(out_big, ref_big, atol=1e-5), "mismatch vs reference (tiled batch)"

    print("KERNEL_OK")
</pallas_src>

<mosaic_0001>
module attributes {stable_mosaic.version = 11 : i64} {
  func.func @critic_kernel(%arg0: i32, %arg1: memref<8x4xf32, #tpu.memory_space<vmem>>, %arg2: memref<4x128xf32, #tpu.memory_space<vmem>>, %arg3: memref<1x128xf32, #tpu.memory_space<vmem>>, %arg4: memref<1x128xf32, #tpu.memory_space<vmem>>, %arg5: memref<1x1xf32, #tpu.memory_space<smem>>, %arg6: memref<1x8xf32, #tpu.memory_space<vmem>>) attributes {dimension_semantics = [#tpu.dimension_semantics<parallel>], iteration_bounds = array<i64: 1>, scalar_prefetch = 0 : i64, scratch_operands = 0 : i64, tpu.core_type = #tpu.core_type<tc>, window_params = [{transform_indices = @transform_0, window_bounds = array<i64: 8, 4>}, {pipeline_mode = #tpu.pipeline_mode<synchronous>, transform_indices = @transform_1, window_bounds = array<i64: 4, 128>}, {pipeline_mode = #tpu.pipeline_mode<synchronous>, transform_indices = @transform_2, window_bounds = array<i64: 1, 128>}, {pipeline_mode = #tpu.pipeline_mode<synchronous>, transform_indices = @transform_3, window_bounds = array<i64: 1, 128>}, {transform_indices = @transform_4, window_bounds = array<i64: 1, 1>}, {transform_indices = @transform_5, window_bounds = array<i64: 1, 8>}]} {
    %c0 = arith.constant 0 : index
    %c0_0 = arith.constant 0 : index
    %0 = vector.load %arg1[%c0, %c0_0] : memref<8x4xf32, #tpu.memory_space<vmem>>, vector<8x4xf32>
    %c0_1 = arith.constant 0 : index
    %c0_2 = arith.constant 0 : index
    %1 = vector.load %arg2[%c0_1, %c0_2] : memref<4x128xf32, #tpu.memory_space<vmem>>, vector<4x128xf32>
    %cst = arith.constant dense<0.000000e+00> : vector<8x128xf32>
    %2 = tpu.matmul %0, %1, %cst {dimension_numbers = #tpu.dot_dimension_numbers<[1], [0], [0], [1], [0, 0, 1, 1], [], []>} : vector<8x4xf32>, vector<4x128xf32>, vector<8x128xf32> -> vector<8x128xf32>
    %c0_3 = arith.constant 0 : index
    %c0_4 = arith.constant 0 : index
    %3 = vector.load %arg3[%c0_3, %c0_4] : memref<1x128xf32, #tpu.memory_space<vmem>>, vector<1x128xf32>
    %4 = vector.broadcast %3 : vector<1x128xf32> to vector<8x128xf32>
    %5 = arith.addf %2, %4 : vector<8x128xf32>
    %cst_5 = arith.constant 0.000000e+00 : f32
    %6 = vector.broadcast %cst_5 : f32 to vector<8x128xf32>
    %7 = arith.maximumf %5, %6 : vector<8x128xf32>
    %c0_6 = arith.constant 0 : index
    %c0_7 = arith.constant 0 : index
    %8 = vector.load %arg4[%c0_6, %c0_7] : memref<1x128xf32, #tpu.memory_space<vmem>>, vector<1x128xf32>
    %9 = vector.broadcast %8 : vector<1x128xf32> to vector<8x128xf32>
    %10 = arith.mulf %7, %9 : vector<8x128xf32>
    %cst_8 = arith.constant dense<0.000000e+00> : vector<8xf32>
    %11 = vector.multi_reduction <add>, %10, %cst_8 [1] : vector<8x128xf32> to vector<8xf32>
    %c0_9 = arith.constant 0 : index
    %c0_10 = arith.constant 0 : index
    %12 = memref.load %arg5[%c0_9, %c0_10] : memref<1x1xf32, #tpu.memory_space<smem>>
    %13 = vector.broadcast %12 : f32 to vector<8xf32>
    %14 = arith.addf %11, %13 : vector<8xf32>
    %15 = vector.shape_cast %14 : vector<8xf32> to vector<1x8xf32>
    %c0_11 = arith.constant 0 : index
    %c0_12 = arith.constant 0 : index
    %16 = vector.load %arg6[%c0_11, %c0_12] : memref<1x8xf32, #tpu.memory_space<vmem>>, vector<1x8xf32>
    tpu.vector_store %arg6[%c0_11, %c0_12], %15 {strides = array<i32>} : memref<1x8xf32, #tpu.memory_space<vmem>>, vector<1x8xf32>,
    return
  }
  func.func @transform_0(%arg0: i32) -> (i32, i32) {
    %c0_i32 = arith.constant 0 : i32
    %c0_i32_0 = arith.constant 0 : i32
    return %arg0, %c0_i32 : i32, i32
  }
  func.func @transform_1(%arg0: i32) -> (i32, i32) {
    %c0_i32 = arith.constant 0 : i32
    %c0_i32_0 = arith.constant 0 : i32
    %c0_i32_1 = arith.constant 0 : i32
    return %c0_i32, %c0_i32_0 : i32, i32
  }
  func.func @transform_2(%arg0: i32) -> (i32, i32) {
    %c0_i32 = arith.constant 0 : i32
    %c0_i32_0 = arith.constant 0 : i32
    %c0_i32_1 = arith.constant 0 : i32
    return %c0_i32, %c0_i32_0 : i32, i32
  }
  func.func @transform_3(%arg0: i32) -> (i32, i32) {
    %c0_i32 = arith.constant 0 : i32
    %c0_i32_0 = arith.constant 0 : i32
    %c0_i32_1 = arith.constant 0 : i32
    return %c0_i32, %c0_i32_0 : i32, i32
  }
  func.func @transform_4(%arg0: i32) -> (i32, i32) {
    %c0_i32 = arith.constant 0 : i32
    %c0_i32_0 = arith.constant 0 : i32
    %c0_i32_1 = arith.constant 0 : i32
    return %c0_i32, %c0_i32_0 : i32, i32
  }
  func.func @transform_5(%arg0: i32) -> (i32, i32) {
    %c0_i32 = arith.constant 0 : i32
    %c0_i32_0 = arith.constant 0 : i32
    return %c0_i32, %arg0 : i32, i32
  }
}

</mosaic_0001>

<bundles_post_ra>
// kernel: tpu_custom_call.1
= control target key start
LH: loop header
LB: loop body
LE: loop exit
PB: predicated region body
PF: predicated region fallthrough
CT: control target
= control target key end

     0   :  { %vm35_vm0 = vcmask 1043456   ;;  %v185_v2 = vmov 0.0   ;;  %vm186_vm1 = vmmov 0   ;;  %vm31_vm2 = vcmask 31744   ;;  %s245_s0 = inlined_call_operand.vmem [shape: f32[8,4], index: 0, kind: input, shape index: {}]   ;;  %s246_s1 = inlined_call_operand.vmem [shape: f32[4,128], index: 1, kind: input, shape index: {}]   ;;  %s247_s2 = inlined_call_operand.vmem [shape: f32[1,128], index: 2, kind: input, shape index: {}]   ;;  %s248_s3 = inlined_call_operand.vmem [shape: f32[1,128], index: 3, kind: input, shape index: {}]   ;;  %s249_s4 = inlined_call_operand.<no memory space> [shape: f32[1,1], index: 4, kind: input, shape index: {}]   ;;  %s250_s5 = inlined_call_operand.hbm [shape: f32[1,8], index: 5, kind: output, shape index: {}]  }
   0x1   :  { %v23_v0 = vld [vmem:[%s246_s1] sm:$0xf]  ;;  %153 = vmatprep.subr.mxu0 %v185_v2  ;;  %155 = vmatprep.mubr.msk.f32.mxu0 %vm186_vm1, %v185_v2 }
   0x2   :  { %v22_v1 = vld [vmem:[%s245_s0] sm:$0xff] }
   0x3   :  { %11 = vsyncpa [#allocation4], 0  ;;  %154 = vmatpush3.msk.msra.mxu0 %vm35_vm0, %v23_v0  ;;  %v147_v3 = vld [vmem:[%s247_s2] ss:$0 sm:$0xff]  ;;  %v124_v10 = vlaneseq  ;;  %v121_v13 = vstv %s249_s4  ;;  %s187_s2 = smov [#allocation3]   ;;  %vm131_vm3 = vcmask 57344  }
   0x4   :  { %156 = vmatmul.mubr.msk.f32.vlgmr.msra.gmra.mrb[0].mxu0 %vm31_vm2, %v22_v1  ;;  %v150_v7 = vld [vmem:[%s248_s3] ss:$0 sm:$0xff]  ;;  %s139_s26 = sshll.u32 %s187_s2, 4  ;;  %s140_s26 = int_to_ptr.vmem [resolvable:$true] %s139_s26 }
   0x5   :  { %v125_v11 = vand.u32 127, %v124_v10  ;;  %v127_v12 = vshrl.u32 %v124_v10, 7  ;;  %s161_s3 = scalar_lea.vmem %s140_s26, 16  ;;  %s165_s27 = scalar_lea.vmem %s140_s26, 32 }
   0x6   :  { %p162_p0 = scmp.ne.s32.totalorder %s140_s26, %s161_s3  ;;  %p166_p1 = scmp.lt.s32.totalorder %s140_s26, %s140_s26 }
   0x7   :  { %v128_v14 = vsub.s32 %v125_v11, %v127_v12  ;;  %p167_p2 = scmp.lt.s32.totalorder %s165_s27, %s161_s3 }
   0x9   :  { %p168_p3 = por %p167_p2, %p166_p1 }
   0xb   :  { %p169_p4 = pnand %p168_p3, %p162_p0 }
  0xd7   :  { %v105_v4 = vpop.f32.mrb[0].mxu0 }
  0xd8   :  { %v106_v5 = vadd.f32 %v147_v3, %v105_v4  ;;  %v157_v6 = vpop.f32.mrb[1].mxu0 }
  0xda   :  { %v109_v8 = vmax.f32 %v106_v5, 0.0 }
  0xdc   :  { %v117_v9 = vmul.f32 %v150_v7, %v109_v8 }
  0xde   :  { %118 = vadd.xlane.f32.xlu0 %v117_v9 }
 0x16b   :  { %v119_v15 = vpop.xlane.xlu0 %118 }
 0x16c   :  { %v122_v16 = vadd.f32 %v121_v13, %v119_v15 }
 0x16e   :  { %v129_v17 = vrot.slane %v122_v16, %v128_v14 }
 0x170   :  { %132 = vst.msk [vmem:[#allocation3] sm:$0x1] %vm131_vm3, %v129_v17 }
 0x171   :  { %172 = shalt.err (!%p169_p4)
}
 0x172   :  { %s173_s4 = scalar_lea.hbm %s250_s5, 16 }
 0x173   :  { %p174_p5 = scmp.ne.s32.totalorder %s250_s5, %s173_s4  ;;  %p177_p6 = scmp.lt.u32.totalorder %s173_s4, %s250_s5 }
 0x175   :  { %p179_p7 = pnand %p177_p6, %p174_p5 }
 0x177   :  { %182 = shalt.err (!%p179_p7)
}
 0x178   :  { %142 = dma.vmem_to_hbm [thread:$0]  %s140_s26, 16, %s250_s5, [#allocation4]  }
 0x179   :  { %183 = dma.done.wait [#allocation4], 16  }
 0x17a   :  { %184 = vsyncadd [#allocation4], 4294967280 }
 0x17b   :  { %146 = vsyncpa [#allocation4], 1 }

</bundles_post_ra>
